<compile_context>
chip_gen: v7x
topology: tpu7x:2x2x1
jax: 0.10.0
libtpu: 0.0.40
codegen_flags: <defaults>
</compile_context>

<pallas_src>
import numpy as np

import jax
import jax.numpy as jnp
from jax import lax
from jax.experimental import pallas as pl
from jax.experimental.pallas import tpu as pltpu

MEAN = 0.1307
SIGMA = 0.3081
LANE = 128
SUBLANE = 8


def _round_up(v, m):
    return ((v + m - 1) // m) * m


def _conv_out(size, k, s, p):
    return (size + 2 * p - k) // s + 1


def _group_rows(h, k, s, p, oh):
    # rows of the row-grouped buffer needed for reads (taps) and writes (rows)
    need_read = (k - 1) // s + oh
    need_write = (h - 1 + p) // s + 1
    return max(need_read, need_write)


# ---------------------------------------------------------------------------
# Fused kernel: convs (merged kernel-row matmuls, batched M) -> FC stack
# ---------------------------------------------------------------------------
def _build_fused_kernel(conv_meta, n_fc, bt):
    n_conv = len(conv_meta)

    def kernel(*refs):
        x_ref = refs[0]
        conv_refs = refs[1:1 + 2 * n_conv]
        fc_refs = refs[1 + 2 * n_conv:1 + 2 * n_conv + 2 * n_fc]
        out_ref = refs[1 + 2 * n_conv + 2 * n_fc]
        scratches = refs[2 + 2 * n_conv + 2 * n_fc:]

        act = None                                  # (OH, bt, OW*Cout)
        for l, m in enumerate(conv_meta):
            b_ref = conv_refs[2 * l]                # (D, L, OWC) merged row ops
            bias_ref = conv_refs[2 * l + 1]         # (OH, 1, OWC)
            D, OH, L, OWC = m["D"], m["OH"], m["L"], m["OWC"]
            src = x_ref if l == 0 else scratches[l - 1]

            acc = jnp.zeros((OH * bt, OWC), jnp.float32)
            for d in range(D):                      # ceil(K/stride) deep dots
                tap = src[d:d + OH, :, :].reshape(OH * bt, L)
                acc = acc + jnp.dot(tap, b_ref[d],
                                    preferred_element_type=jnp.float32)
            act = jnp.maximum(acc.reshape(OH, bt, OWC) + bias_ref[...], 0.0)

            if l + 1 < n_conv:
                # scatter output rows into the next layer's row-grouped input
                # buffer: one full-sublane (bt, wcn) store per output row.
                nxt = conv_meta[l + 1]
                sn, pn, GRn = nxt["s"], nxt["p"], nxt["GR"]
                wcn = nxt["W"] * nxt["Cin"]         # == OWC
                scr = scratches[l]
                for oh in range(OH):
                    h = oh + pn
                    r, q = h // sn, h % sn
                    scr[r, :, q * wcn:(q + 1) * wcn] = act[oh]
                # only the static zero-padding slots are (re)written each step
                zero_blk = jnp.zeros((bt, wcn), jnp.float32)
                for h in list(range(pn)) + list(range(OH + pn, GRn * sn)):
                    r, q = h // sn, h % sn
                    scr[r, :, q * wcn:(q + 1) * wcn] = zero_blk

        # ---- flatten + FC1 as accumulation over conv rows (no lane concat) --
        OH_L = conv_meta[-1]["OH"]
        w1_ref, b1_ref = fc_refs[0], fc_refs[1]     # (OH_L, OWC_L, P1), (1, P1)
        y = None
        for h in range(OH_L):
            t = jnp.dot(act[h], w1_ref[h], preferred_element_type=jnp.float32)
            y = t if y is None else y + t
        y = y + b1_ref[...]
        if n_fc > 1:
            y = jnp.maximum(y, 0.0)
        for k in range(1, n_fc):
            w_ref, bk_ref = fc_refs[2 * k], fc_refs[2 * k + 1]
            y = jnp.dot(y, w_ref[...],
                        preferred_element_type=jnp.float32) + bk_ref[...]
            if k + 1 < n_fc:
                y = jnp.maximum(y, 0.0)

        out_ref[...] = y.astype(out_ref.dtype)      # one lane-dense (bt, 128)

    return kernel


# ---------------------------------------------------------------------------
# The Conv model (mirrors the PyTorch module's layer construction)
# ---------------------------------------------------------------------------
class ConvPallas:
    def __init__(self, input_size, conv_layers, fc_layers, n_class=10, key=None):
        if key is None:
            key = jax.random.PRNGKey(0)
        self.input_size = input_size
        self.n_class = n_class

        # ---- raw parameters (PyTorch-style init), kept for the reference ----
        self.conv_params = []      # (w, b, stride, padding) ; w: (OC, C, K, K)
        self.fc_params = []        # (w, b) ; w: (out, in)

        prev_channels = 1
        img_dim = input_size
        conv_meta = []
        for n_channels, kernel_size, stride, padding in conv_layers:
            key, kw_, kb_ = jax.random.split(key, 3)
            fan_in = prev_channels * kernel_size * kernel_size
            bound = 1.0 / float(np.sqrt(fan_in))
            w = jax.random.uniform(
                kw_, (n_channels, prev_channels, kernel_size, kernel_size),
                minval=-bound, maxval=bound, dtype=jnp.float32)
            b = jax.random.uniform(kb_, (n_channels,), minval=-bound,
                                   maxval=bound, dtype=jnp.float32)
            self.conv_params.append((w, b, stride, padding))

            out_dim = _conv_out(img_dim, kernel_size, stride, padding)
            conv_meta.append(dict(
                W=img_dim, Cin=prev_channels, K=kernel_size, s=stride,
                p=padding, OH=out_dim, OW=out_dim, Cout=n_channels,
                GR=_group_rows(img_dim, kernel_size, stride, padding, out_dim),
                L=stride * img_dim * prev_channels,
                D=(kernel_size - 1) // stride + 1,
                OWC=out_dim * n_channels))
            prev_channels = n_channels
            img_dim = out_dim          # exact conv output size

        self.conv_meta = conv_meta

        prev_fc_size = prev_channels * img_dim * img_dim
        for fc_size in fc_layers:
            key, kw_, kb_ = jax.random.split(key, 3)
            bound = 1.0 / float(np.sqrt(prev_fc_size))
            w = jax.random.uniform(kw_, (fc_size, prev_fc_size),
                                   minval=-bound, maxval=bound,
                                   dtype=jnp.float32)
            b = jax.random.uniform(kb_, (fc_size,), minval=-bound,
                                   maxval=bound, dtype=jnp.float32)
            self.fc_params.append((w, b))
            prev_fc_size = fc_size

        self.out_dim = fc_layers[-1]

        self._pack_params()
        self._forward_jit = jax.jit(self._forward)

    # -- pre-fold / pre-permute / pre-pad all weights (init-time only) -------
    def _pack_params(self):
        self.conv_packed = []      # (B_op, bias) per conv layer
        for l, (w, b, s, p) in enumerate(self.conv_params):
            m = self.conv_meta[l]
            K, W, Cin = m["K"], m["W"], m["Cin"]
            OH, OW, Cout = m["OH"], m["OW"], m["Cout"]
            D, L = m["D"], m["L"]
            wt = np.asarray(w, dtype=np.float32)           # (OC, Cin, K, K)
            bv = np.asarray(b, dtype=np.float32)

            if l == 0:
                wt = wt / SIGMA                            # fold 1/sigma
                # exact mean fold: per-output-position bias plane (accounts for
                # zero padding applied AFTER normalization in the reference)
                bias_plane = np.zeros((OH, OW, Cout), np.float32)
                for oh in range(OH):
                    for ow in range(OW):
                        val = bv.copy()
                        for i in range(K):
                            for j in range(K):
                                hh = s * oh + i - p
                                ww = s * ow + j - p
                                if 0 <= hh < W and 0 <= ww < W:
                                    val = val - MEAN * wt[:, :, i, j].sum(axis=1)
                        bias_plane[oh, ow] = val
                bias_arr = bias_plane.reshape(OH, 1, OW * Cout)
            else:
                bias_arr = np.tile(np.tile(bv, OW).reshape(1, 1, OW * Cout),
                                   (OH, 1, 1))

            # Merged row operators B_op[d] : (stride*W*Cin, OW*Cout).
            # Kernel rows i with the same i//stride are folded into one dot;
            # horizontal stride/padding is baked into the columns.
            B_op = np.zeros((D, L, OW * Cout), np.float32)
            for i in range(K):
                d, q = i // s, i % s
                for ow in range(OW):
                    for j in range(K):
                        wcol = s * ow + j - p
                        if 0 <= wcol < W:
                            r0 = q * W * Cin + wcol * Cin
                            B_op[d, r0:r0 + Cin,
                                 ow * Cout:(ow + 1) * Cout] += wt[:, :, i, j].T
            self.conv_packed.append((jnp.asarray(B_op), jnp.asarray(bias_arr)))

        last = self.conv_meta[-1]
        OH_L, OW_L, C_L = last["OH"], last["OW"], last["Cout"]
        self.fc_packed = []
        prev_pad = None
        for k, (w, b) in enumerate(self.fc_params):
            wn = np.asarray(w, dtype=np.float32)           # (out, in)
            bn = np.asarray(b, dtype=np.float32)
            out_f, in_f = wn.shape
            out_pad = _round_up(out_f, LANE)
            if k == 0:
                # FC1 kept per-conv-row: (out, c*h*w) -> (h, w*c, out_pad) so the
                # kernel accumulates sum_h act[h] @ W1[h] (no flatten concat).
                wn = wn.reshape(out_f, C_L, OH_L, OW_L)
                wn = wn.transpose(2, 3, 1, 0).reshape(OH_L, OW_L * C_L, out_f)
                wn = np.pad(wn, ((0, 0), (0, 0), (0, out_pad - out_f)))
            else:
                wn = np.pad(wn.T, ((0, prev_pad - in_f), (0, out_pad - out_f)))
            bn = np.pad(bn, (0, out_pad - out_f)).reshape(1, out_pad)
            self.fc_packed.append((jnp.asarray(wn), jnp.asarray(bn)))
            prev_pad = out_pad
        self.out_pad = prev_pad

    # -- fused forward --------------------------------------------------------
    def _forward(self, x):
        m0 = self.conv_meta[0]
        B = x.shape[0]
        H = W = self.input_size
        Cin = m0["Cin"]
        x = x.astype(jnp.float32)

        # Batch tile: sublane-aligned, large enough to fill the MXU M dim,
        # and >= 2 grid steps so "parallel" shards across both v7x TCs.
        bt = min(128, _round_up(max(B, 1), SUBLANE))
        n_tiles = max(2, pl.cdiv(B, bt))
        Bp = n_tiles * bt
        if Bp > B:
            x = jnp.pad(x, ((0, Bp - B), (0, 0), (0, 0), (0, 0)))

        GR1, s1, p1, L1 = m0["GR"], m0["s"], m0["p"], m0["L"]
        WC = W * Cin
        # NCHW -> (H, Bp, W*C): batch in the sublane dim, (w, c) in lanes;
        # then vertical zero-pad and regroup rows by the first conv's stride.
        xr = jnp.transpose(x, (2, 0, 3, 1)).reshape(H, Bp, WC)
        xr = jnp.pad(xr, ((p1, GR1 * s1 - H - p1), (0, 0), (0, 0)))
        xg = xr.reshape(GR1, s1, Bp, WC).transpose(0, 2, 1, 3)
        xg = xg.reshape(GR1, Bp, L1)

        kernel = _build_fused_kernel(self.conv_meta, len(self.fc_packed), bt)

        weight_args = []
        in_specs = [pl.BlockSpec((GR1, bt, L1), lambda i: (0, i, 0))]
        for pair in list(self.conv_packed) + list(self.fc_packed):
            for a in pair:
                weight_args.append(a)
                in_specs.append(
                    pl.BlockSpec(a.shape, lambda i, _n=a.ndim: (0,) * _n))

        scratch_shapes = [
            pltpu.VMEM((self.conv_meta[l]["GR"], bt, self.conv_meta[l]["L"]),
                       jnp.float32)
            for l in range(1, len(self.conv_meta))
        ]

        out = pl.pallas_call(
            kernel,
            out_shape=jax.ShapeDtypeStruct((Bp, self.out_pad), jnp.float32),
            grid_spec=pltpu.PrefetchScalarGridSpec(
                num_scalar_prefetch=0,
                grid=(n_tiles,),
                in_specs=in_specs,
                out_specs=pl.BlockSpec((bt, self.out_pad), lambda i: (i, 0)),
                scratch_shapes=scratch_shapes,
            ),
            compiler_params=pltpu.CompilerParams(
                dimension_semantics=("parallel",)),
        )(xg, *weight_args)

        return out[:B, :self.out_dim]

    def __call__(self, x):
        return self._forward_jit(x)


# ---------------------------------------------------------------------------
# Pure-JAX reference (the original PyTorch semantics) for validation
# ---------------------------------------------------------------------------
def reference_forward(model, x):
    x = x.astype(jnp.float32)
    x = (x - MEAN) / SIGMA
    for (w, b, s, p) in model.conv_params:
        x = lax.conv_general_dilated(
            x, w, window_strides=(s, s), padding=((p, p), (p, p)),
            dimension_numbers=("NCHW", "OIHW", "NCHW"),
            precision=lax.Precision.HIGHEST)
        x = jnp.maximum(x + b.reshape(1, -1, 1, 1), 0.0)
    x = x.reshape(x.shape[0], -1)
    n_fc = len(model.fc_params)
    for i, (w, b) in enumerate(model.fc_params):
        x = jnp.dot(x, w.T, precision=lax.Precision.HIGHEST) + b
        if i + 1 < n_fc:
            x = jnp.maximum(x, 0.0)
    return x


# ---------------------------------------------------------------------------
if __name__ == "__main__":
    key = jax.random.PRNGKey(0)
    k_in, k_params = jax.random.split(key)

    # Small MNIST-like configuration: 1 input channel, 16x16 images.
    input_size = 16
    conv_layers = [(4, 3, 2, 1), (8, 3, 2, 1)]   # (channels, kernel, stride, pad)
    fc_layers = [32, 10]

    model = ConvPallas(input_size, conv_layers, fc_layers, n_class=10,
                       key=k_params)

    x = jax.random.uniform(k_in, (2, 1, input_size, input_size),
                           dtype=jnp.float32)

    out = jax.block_until_ready(model(x))
    assert out.shape == (2, 10), out.shape
    assert out.dtype == jnp.float32

    ref = jax.block_until_ready(reference_forward(model, x))
    err = float(jnp.max(jnp.abs(out - ref)))
    assert err < 1e-3, f"mismatch vs reference: {err}"
    print("KERNEL_OK")
</pallas_src>

<mosaic_0001>
module attributes {stable_mosaic.version = 11 : i64} {
  func.func @kernel(%arg0: i32, %arg1: memref<9x8x32xf32, #tpu.memory_space<vmem>>, %arg2: memref<2x32x32xf32, #tpu.memory_space<vmem>>, %arg3: memref<8x1x32xf32, #tpu.memory_space<vmem>>, %arg4: memref<2x64x32xf32, #tpu.memory_space<vmem>>, %arg5: memref<4x1x32xf32, #tpu.memory_space<vmem>>, %arg6: memref<4x32x128xf32, #tpu.memory_space<vmem>>, %arg7: memref<1x128xf32, #tpu.memory_space<vmem>>, %arg8: memref<128x128xf32, #tpu.memory_space<vmem>>, %arg9: memref<1x128xf32, #tpu.memory_space<vmem>>, %arg10: memref<8x128xf32, #tpu.memory_space<vmem>>, %arg11: memref<5x8x64xf32, #tpu.memory_space<vmem>>) attributes {dimension_semantics = [#tpu.dimension_semantics<parallel>], iteration_bounds = array<i64: 2>, scalar_prefetch = 0 : i64, scratch_operands = 1 : i64, tpu.core_type = #tpu.core_type<tc>, window_params = [{transform_indices = @transform_0, window_bounds = array<i64: 9, 8, 32>}, {pipeline_mode = #tpu.pipeline_mode<synchronous>, transform_indices = @transform_1, window_bounds = array<i64: 2, 32, 32>}, {pipeline_mode = #tpu.pipeline_mode<synchronous>, transform_indices = @transform_2, window_bounds = array<i64: 8, 1, 32>}, {pipeline_mode = #tpu.pipeline_mode<synchronous>, transform_indices = @transform_3, window_bounds = array<i64: 2, 64, 32>}, {pipeline_mode = #tpu.pipeline_mode<synchronous>, transform_indices = @transform_4, window_bounds = array<i64: 4, 1, 32>}, {pipeline_mode = #tpu.pipeline_mode<synchronous>, transform_indices = @transform_5, window_bounds = array<i64: 4, 32, 128>}, {pipeline_mode = #tpu.pipeline_mode<synchronous>, transform_indices = @transform_6, window_bounds = array<i64: 1, 128>}, {pipeline_mode = #tpu.pipeline_mode<synchronous>, transform_indices = @transform_7, window_bounds = array<i64: 128, 128>}, {pipeline_mode = #tpu.pipeline_mode<synchronous>, transform_indices = @transform_8, window_bounds = array<i64: 1, 128>}, {transform_indices = @transform_9, window_bounds = array<i64: 8, 128>}]} {
    %cst = arith.constant 0.000000e+00 : f32
    %0 = vector.broadcast %cst : f32 to vector<64x32xf32>
    %c0 = arith.constant 0 : index
    %c0_0 = arith.constant 0 : index
    %c0_1 = arith.constant 0 : index
    %1 = vector.load %arg1[%c0, %c0_0, %c0_1] : memref<9x8x32xf32, #tpu.memory_space<vmem>>, vector<8x8x32xf32>
    %2 = vector.shape_cast %1 : vector<8x8x32xf32> to vector<64x32xf32>
    %c0_2 = arith.constant 0 : index
    %c0_3 = arith.constant 0 : index
    %c0_4 = arith.constant 0 : index
    %3 = vector.load %arg2[%c0_2, %c0_3, %c0_4] : memref<2x32x32xf32, #tpu.memory_space<vmem>>, vector<1x32x32xf32>
    %4 = vector.shape_cast %3 : vector<1x32x32xf32> to vector<32x32xf32>
    %cst_5 = arith.constant dense<0.000000e+00> : vector<64x32xf32>
    %5 = tpu.matmul %2, %4, %cst_5 {dimension_numbers = #tpu.dot_dimension_numbers<[1], [0], [0], [1], [0, 0, 1, 1], [], []>} : vector<64x32xf32>, vector<32x32xf32>, vector<64x32xf32> -> vector<64x32xf32>
    %6 = arith.addf %0, %5 : vector<64x32xf32>
    %c1 = arith.constant 1 : index
    %c0_6 = arith.constant 0 : index
    %c0_7 = arith.constant 0 : index
    %7 = vector.load %arg1[%c1, %c0_6, %c0_7] : memref<9x8x32xf32, #tpu.memory_space<vmem>>, vector<8x8x32xf32>
    %8 = vector.shape_cast %7 : vector<8x8x32xf32> to vector<64x32xf32>
    %c1_8 = arith.constant 1 : index
    %c0_9 = arith.constant 0 : index
    %c0_10 = arith.constant 0 : index
    %9 = vector.load %arg2[%c1_8, %c0_9, %c0_10] : memref<2x32x32xf32, #tpu.memory_space<vmem>>, vector<1x32x32xf32>
    %10 = vector.shape_cast %9 : vector<1x32x32xf32> to vector<32x32xf32>
    %cst_11 = arith.constant dense<0.000000e+00> : vector<64x32xf32>
    %11 = tpu.matmul %8, %10, %cst_11 {dimension_numbers = #tpu.dot_dimension_numbers<[1], [0], [0], [1], [0, 0, 1, 1], [], []>} : vector<64x32xf32>, vector<32x32xf32>, vector<64x32xf32> -> vector<64x32xf32>
    %12 = arith.addf %6, %11 : vector<64x32xf32>
    %13 = vector.shape_cast %12 : vector<64x32xf32> to vector<8x8x32xf32>
    %c0_12 = arith.constant 0 : index
    %c0_13 = arith.constant 0 : index
    %c0_14 = arith.constant 0 : index
    %14 = vector.load %arg3[%c0_12, %c0_13, %c0_14] : memref<8x1x32xf32, #tpu.memory_space<vmem>>, vector<8x1x32xf32>
    %15 = vector.broadcast %14 : vector<8x1x32xf32> to vector<8x8x32xf32>
    %16 = arith.addf %13, %15 : vector<8x8x32xf32>
    %cst_15 = arith.constant 0.000000e+00 : f32
    %17 = vector.broadcast %cst_15 : f32 to vector<8x8x32xf32>
    %18 = arith.maximumf %16, %17 : vector<8x8x32xf32>
    %19 = vector.extract_strided_slice %18 {offsets = [0, 0, 0], sizes = [1, 8, 32], strides = [1, 1, 1]} : vector<8x8x32xf32> to vector<1x8x32xf32>
    %20 = vector.shape_cast %19 : vector<1x8x32xf32> to vector<8x32xf32>
    %c0_16 = arith.constant 0 : index
    %c0_17 = arith.constant 0 : index
    %c32 = arith.constant 32 : index
    %21 = vector.load %arg11[%c0_16, %c0_17, %c32] : memref<5x8x64xf32, #tpu.memory_space<vmem>>, vector<1x8x32xf32>
    %22 = vector.shape_cast %21 : vector<1x8x32xf32> to vector<8x32xf32>
    %23 = vector.shape_cast %20 : vector<8x32xf32> to vector<1x8x32xf32>
    tpu.vector_store %arg11[%c0_16, %c0_17, %c32], %23 {strides = array<i32>} : memref<5x8x64xf32, #tpu.memory_space<vmem>>, vector<1x8x32xf32>,
    %24 = vector.extract_strided_slice %18 {offsets = [1, 0, 0], sizes = [1, 8, 32], strides = [1, 1, 1]} : vector<8x8x32xf32> to vector<1x8x32xf32>
    %25 = vector.shape_cast %24 : vector<1x8x32xf32> to vector<8x32xf32>
    %c1_18 = arith.constant 1 : index
    %c0_19 = arith.constant 0 : index
    %c0_20 = arith.constant 0 : index
    %26 = vector.load %arg11[%c1_18, %c0_19, %c0_20] : memref<5x8x64xf32, #tpu.memory_space<vmem>>, vector<1x8x32xf32>
    %27 = vector.shape_cast %26 : vector<1x8x32xf32> to vector<8x32xf32>
    %28 = vector.shape_cast %25 : vector<8x32xf32> to vector<1x8x32xf32>
    tpu.vector_store %arg11[%c1_18, %c0_19, %c0_20], %28 {strides = array<i32>} : memref<5x8x64xf32, #tpu.memory_space<vmem>>, vector<1x8x32xf32>,
    %29 = vector.extract_strided_slice %18 {offsets = [2, 0, 0], sizes = [1, 8, 32], strides = [1, 1, 1]} : vector<8x8x32xf32> to vector<1x8x32xf32>
    %30 = vector.shape_cast %29 : vector<1x8x32xf32> to vector<8x32xf32>
    %c1_21 = arith.constant 1 : index
    %c0_22 = arith.constant 0 : index
    %c32_23 = arith.constant 32 : index
    %31 = vector.load %arg11[%c1_21, %c0_22, %c32_23] : memref<5x8x64xf32, #tpu.memory_space<vmem>>, vector<1x8x32xf32>
    %32 = vector.shape_cast %31 : vector<1x8x32xf32> to vector<8x32xf32>
    %33 = vector.shape_cast %30 : vector<8x32xf32> to vector<1x8x32xf32>
    tpu.vector_store %arg11[%c1_21, %c0_22, %c32_23], %33 {strides = array<i32>} : memref<5x8x64xf32, #tpu.memory_space<vmem>>, vector<1x8x32xf32>,
    %34 = vector.extract_strided_slice %18 {offsets = [3, 0, 0], sizes = [1, 8, 32], strides = [1, 1, 1]} : vector<8x8x32xf32> to vector<1x8x32xf32>
    %35 = vector.shape_cast %34 : vector<1x8x32xf32> to vector<8x32xf32>
    %c2 = arith.constant 2 : index
    %c0_24 = arith.constant 0 : index
    %c0_25 = arith.constant 0 : index
    %36 = vector.load %arg11[%c2, %c0_24, %c0_25] : memref<5x8x64xf32, #tpu.memory_space<vmem>>, vector<1x8x32xf32>
    %37 = vector.shape_cast %36 : vector<1x8x32xf32> to vector<8x32xf32>
    %38 = vector.shape_cast %35 : vector<8x32xf32> to vector<1x8x32xf32>
    tpu.vector_store %arg11[%c2, %c0_24, %c0_25], %38 {strides = array<i32>} : memref<5x8x64xf32, #tpu.memory_space<vmem>>, vector<1x8x32xf32>,
    %39 = vector.extract_strided_slice %18 {offsets = [4, 0, 0], sizes = [1, 8, 32], strides = [1, 1, 1]} : vector<8x8x32xf32> to vector<1x8x32xf32>
    %40 = vector.shape_cast %39 : vector<1x8x32xf32> to vector<8x32xf32>
    %c2_26 = arith.constant 2 : index
    %c0_27 = arith.constant 0 : index
    %c32_28 = arith.constant 32 : index
    %41 = vector.load %arg11[%c2_26, %c0_27, %c32_28] : memref<5x8x64xf32, #tpu.memory_space<vmem>>, vector<1x8x32xf32>
    %42 = vector.shape_cast %41 : vector<1x8x32xf32> to vector<8x32xf32>
    %43 = vector.shape_cast %40 : vector<8x32xf32> to vector<1x8x32xf32>
    tpu.vector_store %arg11[%c2_26, %c0_27, %c32_28], %43 {strides = array<i32>} : memref<5x8x64xf32, #tpu.memory_space<vmem>>, vector<1x8x32xf32>,
    %44 = vector.extract_strided_slice %18 {offsets = [5, 0, 0], sizes = [1, 8, 32], strides = [1, 1, 1]} : vector<8x8x32xf32> to vector<1x8x32xf32>
    %45 = vector.shape_cast %44 : vector<1x8x32xf32> to vector<8x32xf32>
    %c3 = arith.constant 3 : index
    %c0_29 = arith.constant 0 : index
    %c0_30 = arith.constant 0 : index
    %46 = vector.load %arg11[%c3, %c0_29, %c0_30] : memref<5x8x64xf32, #tpu.memory_space<vmem>>, vector<1x8x32xf32>
    %47 = vector.shape_cast %46 : vector<1x8x32xf32> to vector<8x32xf32>
    %48 = vector.shape_cast %45 : vector<8x32xf32> to vector<1x8x32xf32>
    tpu.vector_store %arg11[%c3, %c0_29, %c0_30], %48 {strides = array<i32>} : memref<5x8x64xf32, #tpu.memory_space<vmem>>, vector<1x8x32xf32>,
    %49 = vector.extract_strided_slice %18 {offsets = [6, 0, 0], sizes = [1, 8, 32], strides = [1, 1, 1]} : vector<8x8x32xf32> to vector<1x8x32xf32>
    %50 = vector.shape_cast %49 : vector<1x8x32xf32> to vector<8x32xf32>
    %c3_31 = arith.constant 3 : index
    %c0_32 = arith.constant 0 : index
    %c32_33 = arith.constant 32 : index
    %51 = vector.load %arg11[%c3_31, %c0_32, %c32_33] : memref<5x8x64xf32, #tpu.memory_space<vmem>>, vector<1x8x32xf32>
    %52 = vector.shape_cast %51 : vector<1x8x32xf32> to vector<8x32xf32>
    %53 = vector.shape_cast %50 : vector<8x32xf32> to vector<1x8x32xf32>
    tpu.vector_store %arg11[%c3_31, %c0_32, %c32_33], %53 {strides = array<i32>} : memref<5x8x64xf32, #tpu.memory_space<vmem>>, vector<1x8x32xf32>,
    %54 = vector.extract_strided_slice %18 {offsets = [7, 0, 0], sizes = [1, 8, 32], strides = [1, 1, 1]} : vector<8x8x32xf32> to vector<1x8x32xf32>
    %55 = vector.shape_cast %54 : vector<1x8x32xf32> to vector<8x32xf32>
    %c4 = arith.constant 4 : index
    %c0_34 = arith.constant 0 : index
    %c0_35 = arith.constant 0 : index
    %56 = vector.load %arg11[%c4, %c0_34, %c0_35] : memref<5x8x64xf32, #tpu.memory_space<vmem>>, vector<1x8x32xf32>
    %57 = vector.shape_cast %56 : vector<1x8x32xf32> to vector<8x32xf32>
    %58 = vector.shape_cast %55 : vector<8x32xf32> to vector<1x8x32xf32>
    tpu.vector_store %arg11[%c4, %c0_34, %c0_35], %58 {strides = array<i32>} : memref<5x8x64xf32, #tpu.memory_space<vmem>>, vector<1x8x32xf32>,
    %cst_36 = arith.constant 0.000000e+00 : f32
    %59 = vector.broadcast %cst_36 : f32 to vector<8x32xf32>
    %c0_37 = arith.constant 0 : index
    %c0_38 = arith.constant 0 : index
    %c0_39 = arith.constant 0 : index
    %60 = vector.load %arg11[%c0_37, %c0_38, %c0_39] : memref<5x8x64xf32, #tpu.memory_space<vmem>>, vector<1x8x32xf32>
    %61 = vector.shape_cast %60 : vector<1x8x32xf32> to vector<8x32xf32>
    %62 = vector.shape_cast %59 : vector<8x32xf32> to vector<1x8x32xf32>
    tpu.vector_store %arg11[%c0_37, %c0_38, %c0_39], %62 {strides = array<i32>} : memref<5x8x64xf32, #tpu.memory_space<vmem>>, vector<1x8x32xf32>,
    %c4_40 = arith.constant 4 : index
    %c0_41 = arith.constant 0 : index
    %c32_42 = arith.constant 32 : index
    %63 = vector.load %arg11[%c4_40, %c0_41, %c32_42] : memref<5x8x64xf32, #tpu.memory_space<vmem>>, vector<1x8x32xf32>
    %64 = vector.shape_cast %63 : vector<1x8x32xf32> to vector<8x32xf32>
    %65 = vector.shape_cast %59 : vector<8x32xf32> to vector<1x8x32xf32>
    tpu.vector_store %arg11[%c4_40, %c0_41, %c32_42], %65 {strides = array<i32>} : memref<5x8x64xf32, #tpu.memory_space<vmem>>, vector<1x8x32xf32>,
    %cst_43 = arith.constant 0.000000e+00 : f32
    %66 = vector.broadcast %cst_43 : f32 to vector<32x32xf32>
    %c0_44 = arith.constant 0 : index
    %c0_45 = arith.constant 0 : index
    %c0_46 = arith.constant 0 : index
    %67 = vector.load %arg11[%c0_44, %c0_45, %c0_46] : memref<5x8x64xf32, #tpu.memory_space<vmem>>, vector<4x8x64xf32>
    %68 = vector.shape_cast %67 : vector<4x8x64xf32> to vector<32x64xf32>
    %c0_47 = arith.constant 0 : index
    %c0_48 = arith.constant 0 : index
    %c0_49 = arith.constant 0 : index
    %69 = vector.load %arg4[%c0_47, %c0_48, %c0_49] : memref<2x64x32xf32, #tpu.memory_space<vmem>>, vector<1x64x32xf32>
    %70 = vector.shape_cast %69 : vector<1x64x32xf32> to vector<64x32xf32>
    %cst_50 = arith.constant dense<0.000000e+00> : vector<32x32xf32>
    %71 = tpu.matmul %68, %70, %cst_50 {dimension_numbers = #tpu.dot_dimension_numbers<[1], [0], [0], [1], [0, 0, 1, 1], [], []>} : vector<32x64xf32>, vector<64x32xf32>, vector<32x32xf32> -> vector<32x32xf32>
    %72 = arith.addf %66, %71 : vector<32x32xf32>
    %c1_51 = arith.constant 1 : index
    %c0_52 = arith.constant 0 : index
    %c0_53 = arith.constant 0 : index
    %73 = vector.load %arg11[%c1_51, %c0_52, %c0_53] : memref<5x8x64xf32, #tpu.memory_space<vmem>>, vector<4x8x64xf32>
    %74 = vector.shape_cast %73 : vector<4x8x64xf32> to vector<32x64xf32>
    %c1_54 = arith.constant 1 : index
    %c0_55 = arith.constant 0 : index
    %c0_56 = arith.constant 0 : index
    %75 = vector.load %arg4[%c1_54, %c0_55, %c0_56] : memref<2x64x32xf32, #tpu.memory_space<vmem>>, vector<1x64x32xf32>
    %76 = vector.shape_cast %75 : vector<1x64x32xf32> to vector<64x32xf32>
    %cst_57 = arith.constant dense<0.000000e+00> : vector<32x32xf32>
    %77 = tpu.matmul %74, %76, %cst_57 {dimension_numbers = #tpu.dot_dimension_numbers<[1], [0], [0], [1], [0, 0, 1, 1], [], []>} : vector<32x64xf32>, vector<64x32xf32>, vector<32x32xf32> -> vector<32x32xf32>
    %78 = arith.addf %72, %77 : vector<32x32xf32>
    %79 = vector.shape_cast %78 : vector<32x32xf32> to vector<4x8x32xf32>
    %c0_58 = arith.constant 0 : index
    %c0_59 = arith.constant 0 : index
    %c0_60 = arith.constant 0 : index
    %80 = vector.load %arg5[%c0_58, %c0_59, %c0_60] : memref<4x1x32xf32, #tpu.memory_space<vmem>>, vector<4x1x32xf32>
    %81 = vector.broadcast %80 : vector<4x1x32xf32> to vector<4x8x32xf32>
    %82 = arith.addf %79, %81 : vector<4x8x32xf32>
    %cst_61 = arith.constant 0.000000e+00 : f32
    %83 = vector.broadcast %cst_61 : f32 to vector<4x8x32xf32>
    %84 = arith.maximumf %82, %83 : vector<4x8x32xf32>
    %85 = vector.extract_strided_slice %84 {offsets = [0, 0, 0], sizes = [1, 8, 32], strides = [1, 1, 1]} : vector<4x8x32xf32> to vector<1x8x32xf32>
    %86 = vector.shape_cast %85 : vector<1x8x32xf32> to vector<8x32xf32>
    %c0_62 = arith.constant 0 : index
    %c0_63 = arith.constant 0 : index
    %c0_64 = arith.constant 0 : index
    %87 = vector.load %arg6[%c0_62, %c0_63, %c0_64] : memref<4x32x128xf32, #tpu.memory_space<vmem>>, vector<1x32x128xf32>
    %88 = vector.shape_cast %87 : vector<1x32x128xf32> to vector<32x128xf32>
    %cst_65 = arith.constant dense<0.000000e+00> : vector<8x128xf32>
    %89 = tpu.matmul %86, %88, %cst_65 {dimension_numbers = #tpu.dot_dimension_numbers<[1], [0], [0], [1], [0, 0, 1, 1], [], []>} : vector<8x32xf32>, vector<32x128xf32>, vector<8x128xf32> -> vector<8x128xf32>
    %90 = vector.extract_strided_slice %84 {offsets = [1, 0, 0], sizes = [1, 8, 32], strides = [1, 1, 1]} : vector<4x8x32xf32> to vector<1x8x32xf32>
    %91 = vector.shape_cast %90 : vector<1x8x32xf32> to vector<8x32xf32>
    %c1_66 = arith.constant 1 : index
    %c0_67 = arith.constant 0 : index
    %c0_68 = arith.constant 0 : index
    %92 = vector.load %arg6[%c1_66, %c0_67, %c0_68] : memref<4x32x128xf32, #tpu.memory_space<vmem>>, vector<1x32x128xf32>
    %93 = vector.shape_cast %92 : vector<1x32x128xf32> to vector<32x128xf32>
    %cst_69 = arith.constant dense<0.000000e+00> : vector<8x128xf32>
    %94 = tpu.matmul %91, %93, %cst_69 {dimension_numbers = #tpu.dot_dimension_numbers<[1], [0], [0], [1], [0, 0, 1, 1], [], []>} : vector<8x32xf32>, vector<32x128xf32>, vector<8x128xf32> -> vector<8x128xf32>
    %95 = arith.addf %89, %94 : vector<8x128xf32>
    %96 = vector.extract_strided_slice %84 {offsets = [2, 0, 0], sizes = [1, 8, 32], strides = [1, 1, 1]} : vector<4x8x32xf32> to vector<1x8x32xf32>
    %97 = vector.shape_cast %96 : vector<1x8x32xf32> to vector<8x32xf32>
    %c2_70 = arith.constant 2 : index
    %c0_71 = arith.constant 0 : index
    %c0_72 = arith.constant 0 : index
    %98 = vector.load %arg6[%c2_70, %c0_71, %c0_72] : memref<4x32x128xf32, #tpu.memory_space<vmem>>, vector<1x32x128xf32>
    %99 = vector.shape_cast %98 : vector<1x32x128xf32> to vector<32x128xf32>
    %cst_73 = arith.constant dense<0.000000e+00> : vector<8x128xf32>
    %100 = tpu.matmul %97, %99, %cst_73 {dimension_numbers = #tpu.dot_dimension_numbers<[1], [0], [0], [1], [0, 0, 1, 1], [], []>} : vector<8x32xf32>, vector<32x128xf32>, vector<8x128xf32> -> vector<8x128xf32>
    %101 = arith.addf %95, %100 : vector<8x128xf32>
    %102 = vector.extract_strided_slice %84 {offsets = [3, 0, 0], sizes = [1, 8, 32], strides = [1, 1, 1]} : vector<4x8x32xf32> to vector<1x8x32xf32>
    %103 = vector.shape_cast %102 : vector<1x8x32xf32> to vector<8x32xf32>
    %c3_74 = arith.constant 3 : index
    %c0_75 = arith.constant 0 : index
    %c0_76 = arith.constant 0 : index
    %104 = vector.load %arg6[%c3_74, %c0_75, %c0_76] : memref<4x32x128xf32, #tpu.memory_space<vmem>>, vector<1x32x128xf32>
    %105 = vector.shape_cast %104 : vector<1x32x128xf32> to vector<32x128xf32>
    %cst_77 = arith.constant dense<0.000000e+00> : vector<8x128xf32>
    %106 = tpu.matmul %103, %105, %cst_77 {dimension_numbers = #tpu.dot_dimension_numbers<[1], [0], [0], [1], [0, 0, 1, 1], [], []>} : vector<8x32xf32>, vector<32x128xf32>, vector<8x128xf32> -> vector<8x128xf32>
    %107 = arith.addf %101, %106 : vector<8x128xf32>
    %c0_78 = arith.constant 0 : index
    %c0_79 = arith.constant 0 : index
    %108 = vector.load %arg7[%c0_78, %c0_79] : memref<1x128xf32, #tpu.memory_space<vmem>>, vector<1x128xf32>
    %109 = vector.broadcast %108 : vector<1x128xf32> to vector<8x128xf32>
    %110 = arith.addf %107, %109 : vector<8x128xf32>
    %cst_80 = arith.constant 0.000000e+00 : f32
    %111 = vector.broadcast %cst_80 : f32 to vector<8x128xf32>
    %112 = arith.maximumf %110, %111 : vector<8x128xf32>
    %c0_81 = arith.constant 0 : index
    %c0_82 = arith.constant 0 : index
    %113 = vector.load %arg8[%c0_81, %c0_82] : memref<128x128xf32, #tpu.memory_space<vmem>>, vector<128x128xf32>
    %cst_83 = arith.constant dense<0.000000e+00> : vector<8x128xf32>
    %114 = tpu.matmul %112, %113, %cst_83 {dimension_numbers = #tpu.dot_dimension_numbers<[1], [0], [0], [1], [0, 0, 1, 1], [], []>} : vector<8x128xf32>, vector<128x128xf32>, vector<8x128xf32> -> vector<8x128xf32>
    %c0_84 = arith.constant 0 : index
    %c0_85 = arith.constant 0 : index
    %115 = vector.load %arg9[%c0_84, %c0_85] : memref<1x128xf32, #tpu.memory_space<vmem>>, vector<1x128xf32>
    %116 = vector.broadcast %115 : vector<1x128xf32> to vector<8x128xf32>
    %117 = arith.addf %114, %116 : vector<8x128xf32>
    %c0_86 = arith.constant 0 : index
    %c0_87 = arith.constant 0 : index
    %118 = vector.load %arg10[%c0_86, %c0_87] : memref<8x128xf32, #tpu.memory_space<vmem>>, vector<8x128xf32>
    tpu.vector_store %arg10[%c0_86, %c0_87], %117 {strides = array<i32>} : memref<8x128xf32, #tpu.memory_space<vmem>>, vector<8x128xf32>,
    return
  }
  func.func @transform_0(%arg0: i32) -> (i32, i32, i32) {
    %c0_i32 = arith.constant 0 : i32
    %c0_i32_0 = arith.constant 0 : i32
    %c0_i32_1 = arith.constant 0 : i32
    return %c0_i32, %arg0, %c0_i32_0 : i32, i32, i32
  }
  func.func @transform_1(%arg0: i32) -> (i32, i32, i32) {
    %c0_i32 = arith.constant 0 : i32
    %c0_i32_0 = arith.constant 0 : i32
    %c0_i32_1 = arith.constant 0 : i32
    %c0_i32_2 = arith.constant 0 : i32
    return %c0_i32, %c0_i32_0, %c0_i32_1 : i32, i32, i32
  }
  func.func @transform_2(%arg0: i32) -> (i32, i32, i32) {
    %c0_i32 = arith.constant 0 : i32
    %c0_i32_0 = arith.constant 0 : i32
    %c0_i32_1 = arith.constant 0 : i32
    %c0_i32_2 = arith.constant 0 : i32
    return %c0_i32, %c0_i32_0, %c0_i32_1 : i32, i32, i32
  }
  func.func @transform_3(%arg0: i32) -> (i32, i32, i32) {
    %c0_i32 = arith.constant 0 : i32
    %c0_i32_0 = arith.constant 0 : i32
    %c0_i32_1 = arith.constant 0 : i32
    %c0_i32_2 = arith.constant 0 : i32
    return %c0_i32, %c0_i32_0, %c0_i32_1 : i32, i32, i32
  }
  func.func @transform_4(%arg0: i32) -> (i32, i32, i32) {
    %c0_i32 = arith.constant 0 : i32
    %c0_i32_0 = arith.constant 0 : i32
    %c0_i32_1 = arith.constant 0 : i32
    %c0_i32_2 = arith.constant 0 : i32
    return %c0_i32, %c0_i32_0, %c0_i32_1 : i32, i32, i32
  }
  func.func @transform_5(%arg0: i32) -> (i32, i32, i32) {
    %c0_i32 = arith.constant 0 : i32
    %c0_i32_0 = arith.constant 0 : i32
    %c0_i32_1 = arith.constant 0 : i32
    %c0_i32_2 = arith.constant 0 : i32
    return %c0_i32, %c0_i32_0, %c0_i32_1 : i32, i32, i32
  }
  func.func @transform_6(%arg0: i32) -> (i32, i32) {
    %c0_i32 = arith.constant 0 : i32
    %c0_i32_0 = arith.constant 0 : i32
    %c0_i32_1 = arith.constant 0 : i32
    return %c0_i32, %c0_i32_0 : i32, i32
  }
  func.func @transform_7(%arg0: i32) -> (i32, i32) {
    %c0_i32 = arith.constant 0 : i32
    %c0_i32_0 = arith.constant 0 : i32
    %c0_i32_1 = arith.constant 0 : i32
    return %c0_i32, %c0_i32_0 : i32, i32
  }
  func.func @transform_8(%arg0: i32) -> (i32, i32) {
    %c0_i32 = arith.constant 0 : i32
    %c0_i32_0 = arith.constant 0 : i32
    %c0_i32_1 = arith.constant 0 : i32
    return %c0_i32, %c0_i32_0 : i32, i32
  }
  func.func @transform_9(%arg0: i32) -> (i32, i32) {
    %c0_i32 = arith.constant 0 : i32
    %c0_i32_0 = arith.constant 0 : i32
    return %arg0, %c0_i32 : i32, i32
  }
}

</mosaic_0001>

<bundles_post_ra>
// kernel: _forward.1
= control target key start
LH: loop header
LB: loop body
LE: loop exit
PB: predicated region body
PF: predicated region fallthrough
CT: control target
= control target key end

     0   :  { %s2063_s30 = smov 0   ;;  %s2065_s10 = smov 0   ;;  %s2397_s0 = inlined_call_operand.vmem [shape: f32[9,16,32], index: 0, kind: input, shape index: {}]   ;;  %s2398_s1 = inlined_call_operand.vmem [shape: f32[2,32,32], index: 1, kind: input, shape index: {}]   ;;  %s2399_s2 = inlined_call_operand.vmem [shape: f32[8,1,32], index: 2, kind: input, shape index: {}]   ;;  %s2400_s3 = inlined_call_operand.vmem [shape: f32[2,64,32], index: 3, kind: input, shape index: {}]   ;;  %s2401_s4 = inlined_call_operand.vmem [shape: f32[4,1,32], index: 4, kind: input, shape index: {}]   ;;  %s2402_s5 = inlined_call_operand.vmem [shape: f32[4,32,128], index: 5, kind: input, shape index: {}]   ;;  %s2403_s6 = inlined_call_operand.vmem [shape: f32[1,128], index: 6, kind: input, shape index: {}]   ;;  %s2404_s7 = inlined_call_operand.vmem [shape: f32[128,128], index: 7, kind: input, shape index: {}]   ;;  %s2405_s8 = inlined_call_operand.vmem [shape: f32[1,128], index: 8, kind: input, shape index: {}]   ;;  %s2406_s9 = inlined_call_operand.vmem [shape: f32[16,128], index: 9, kind: output, shape index: {}]  }
   0x1   :  { %s2067_s11 = smov 0  }
   0x2 LB: > { %s1516_s12 = sadd.s32 4294967295, %s2007_s11   ;;  %s2080_s13 = sadd.s32 1, %s2007_s11   ;;  %s2007_s11 = sphi %s2067_s11, %s2409_s11   ;;  %s2003_s10 = sphi %s2065_s10, %s2408_s10   ;;  %s1999_s30 = sphi %s2063_s30, %s2407_s30  }
   0x3   : > { %s23_s14 = ssub.s32 %s2007_s11, %s2080_s13  ;;  %s26_s15 = sadd.s32 1, %s2003_s10 }
   0x4   : > { %p24_p0 = scmp.eq.s32.totalorder %s23_s14, 0  ;;  %p33_p1 = scmp.ne.s32.totalorder %s2003_s10, %s1999_s30 }
   0x5   : > { %p34_p2 = scmp.eq.s32.totalorder %s2007_s11, 0  ;;  %p1519_p4 = scmp.ge.s32.totalorder %s2007_s11, 2 }
   0x6   : > { %s2089_s16 = scalar_select %p24_p0, %s2003_s10, %s26_s15  }
   0x7   : > { %p35_p3 = por %p34_p2, %p33_p1  ;;  %277 = sbr.rel (%p1519_p4) target bundleno = 23 (0x17), region = 48 }
   0xe   : > { %280 = sbr.rel (!%p35_p3) target bundleno = 23 (0x17), region = 52  ;;  %s282_s17 = sand.u32 (%p35_p3), 1, %s2003_s10  }
   0xf   : > { %s1520_s18 = sshll.u32 (%p35_p3), %s2007_s11, 3  ;;  %s1955_s19 = smul.u32 (%p35_p3), 72, %s282_s17 }
  0x10   : > { %s286_s22 = scalar_lea.vmem (%p35_p3), %s2397_s0, %s1520_s18 }
  0x11   : > { %v330_v0 = vld [vmem:[%s286_s22] sm:$0xff] (%p35_p3)  ;;  %v332_v1 = vld [vmem:[%s286_s22 + $0x10] sm:$0xff] (%p35_p3)  ;;  %s284_s23 = scalar_lea.vmem (%p35_p3), [#allocation3], %s1955_s19 }
  0x12   : > { %v334_v2 = vld [vmem:[%s286_s22 + $0x20] sm:$0xff] (%p35_p3)  ;;  %v336_v3 = vld [vmem:[%s286_s22 + $0x30] sm:$0xff] (%p35_p3)  ;;  %331 = vst [vmem:[%s284_s23] sm:$0xff] (%p35_p3), %v330_v0  ;;  %333 = vst [vmem:[%s284_s23 + $0x8] sm:$0xff] (%p35_p3), %v332_v1 }
  0x13   : > { %v338_v4 = vld [vmem:[%s286_s22 + $0x40] sm:$0xff] (%p35_p3)  ;;  %v340_v5 = vld [vmem:[%s286_s22 + $0x50] sm:$0xff] (%p35_p3)  ;;  %335 = vst [vmem:[%s284_s23 + $0x10] sm:$0xff] (%p35_p3), %v334_v2  ;;  %337 = vst [vmem:[%s284_s23 + $0x18] sm:$0xff] (%p35_p3), %v336_v3 }
  0x14   : > { %339 = vst [vmem:[%s284_s23 + $0x20] sm:$0xff] (%p35_p3), %v338_v4  ;;  %341 = vst [vmem:[%s284_s23 + $0x28] sm:$0xff] (%p35_p3), %v340_v5  ;;  %v342_v6 = vld [vmem:[%s286_s22 + $0x60] sm:$0xff] (%p35_p3)  ;;  %v344_v7 = vld [vmem:[%s286_s22 + $0x70] sm:$0xff] (%p35_p3) }
  0x15   : > { %v346_v8 = vld [vmem:[%s286_s22 + $0x80] sm:$0xff]  ;;  %343 = vst [vmem:[%s284_s23 + $0x30] sm:$0xff] %v342_v6  ;;  %345 = vst [vmem:[%s284_s23 + $0x38] sm:$0xff] %v344_v7 }
  0x16   : > { %347 = vst [vmem:[%s284_s23 + $0x40] sm:$0xff] %v346_v8 }
  0x17 PF: > { %p1521_p5 = scmp.ge.s32.totalorder %s2007_s11, 1  ;;  %p352_p6 = scmp.lt.s32.totalorder %s2007_s11, 3 }
  0x19   : > { %p353_p7 = pnand %p1521_p5, %p352_p6 }
  0x1a   : > { %v1531_v9 = vld [vmem:[%s2398_s1 + $0x20] sm:$0xff] (!%p353_p7)  ;;  %v1532_v10 = vld [vmem:[%s2398_s1 + $0x28] sm:$0xff] (!%p353_p7)  ;;  %s359_s14 = sand.u32 (!%p353_p7), 1, %s1999_s30   ;;  %v1533_v14 = vld [vmem:[%s2398_s1 + $0x30] sm:$0xff] (!%p353_p7)  ;;  %vm423_vm0 = vcmask (!%p353_p7), 261120   ;;  %s2009_s27 = smov (!%p353_p7), 32  }
  0x1b   : > { %356 = sbr.rel (%p353_p7) target bundleno = 1063 (0x427), region = 90  ;;  %v405_v11 = vld [vmem:[%s2398_s1] sm:$0xff] (!%p353_p7)  ;;  %v1847_v12 = vpack.c.bf16 (!%p353_p7), %v1532_v10, %v1531_v9  ;;  %v406_v13 = vld [vmem:[%s2398_s1 + $0x8] sm:$0xff] (!%p353_p7)  ;;  %v1534_v15 = vld [vmem:[%s2398_s1 + $0x38] sm:$0xff] (!%p353_p7)  ;;  %vm758_vm1 = vcmask (!%p353_p7), 523520   ;;  %vm810_vm2 = vcmask (!%p353_p7), 523264  }
  0x1c   : > { %s1956_s22 = smul.u32 (!%p353_p7), 72, %s359_s14  ;;  %v1855_v16 = vpack.c.bf16 (!%p353_p7), %v406_v13, %v405_v11  ;;  %v1851_v17 = vpack.c.bf16 (!%p353_p7), %v1534_v15, %v1533_v14  ;;  %v407_v18 = vld [vmem:[%s2398_s1 + $0x10] sm:$0xff] (!%p353_p7)  ;;  %v408_v19 = vld [vmem:[%s2398_s1 + $0x18] sm:$0xff] (!%p353_p7)  ;;  %v1559_v30 = vld [vmem:[%s2400_s3 + $0x40] sm:$0xff] (!%p353_p7)  ;;  %vm2012_vm3 = vmmov (!%p353_p7), 0   ;;  %p393_p8 = scmp.lt.s32.totalorder (!%p353_p7), %s1516_s12, 1 }
  0x1d   : > { %1848 = vmatprep.subr.bf16.mxu1 (!%p353_p7), %v1847_v12  ;;  %v1859_v20 = vpack.c.bf16 (!%p353_p7), %v408_v19, %v407_v18  ;;  %v1560_v31 = vld [vmem:[%s2400_s3 + $0x48] sm:$0xff] (!%p353_p7)  ;;  %v1561_v32 = vld [vmem:[%s2400_s3 + $0x50] sm:$0xff] (!%p353_p7)  ;;  %v1562_v34 = vld [vmem:[%s2400_s3 + $0x58] sm:$0xff] (!%p353_p7) }
  0x1e   : > { %1856 = vmatprep.subr.bf16.mxu0 (!%p353_p7), %v1855_v16  ;;  %1850 = vmatpush3.bf16.msra.mxu1 (!%p353_p7), %v1847_v12  ;;  %s361_s26 = scalar_lea.vmem (!%p353_p7), [#allocation3], %s1956_s22  ;;  %v1863_v33 = vpack.c.bf16 (!%p353_p7), %v1560_v31, %v1559_v30  ;;  %v1867_v35 = vpack.c.bf16 (!%p353_p7), %v1562_v34, %v1561_v32  ;;  %v1563_v37 = vld [vmem:[%s2400_s3 + $0x60] sm:$0xff] (!%p353_p7)  ;;  %v1564_v38 = vld [vmem:[%s2400_s3 + $0x68] sm:$0xff] (!%p353_p7)  ;;  %v1565_v48 = vld [vmem:[%s2400_s3 + $0x70] sm:$0xff] (!%p353_p7) }
  0x1f   : > { %v1523_v21 = vld [vmem:[%s361_s26 + $0x8] sm:$0xff] (!%p353_p7)  ;;  %v397_v22 = vld [vmem:[%s361_s26] sm:$0xff] (!%p353_p7)  ;;  %1858 = vmatpush3.bf16.msra.mxu0 (!%p353_p7), %v1855_v16  ;;  %1852 = vmatprep.subr.bf16.mxu1 (!%p353_p7), %v1851_v17  ;;  %v1524_v23 = vld [vmem:[%s361_s26 + $0x10] sm:$0xff] (!%p353_p7)  ;;  %v1871_v42 = vpack.c.bf16 (!%p353_p7), %v1564_v38, %v1563_v37 }
  0x20   : > { %1860 = vmatprep.subr.bf16.mxu0 (!%p353_p7), %v1859_v20  ;;  %1692 = vmatprep.mubr.msk.f32.mxu1 (!%p353_p7), %vm423_vm0, %v1523_v21  ;;  %v1525_v24 = vld [vmem:[%s361_s26 + $0x18] sm:$0xff] (!%p353_p7)  ;;  %v1526_v25 = vld [vmem:[%s361_s26 + $0x20] sm:$0xff] (!%p353_p7)  ;;  %v1527_v26 = vld [vmem:[%s361_s26 + $0x28] sm:$0xff] (!%p353_p7) }
  0x21   : > { %1712 = vmatprep.mubr.msk.f32.mxu0 (!%p353_p7), %vm423_vm0, %v397_v22  ;;  %v1528_v27 = vld [vmem:[%s361_s26 + $0x30] sm:$0xff] (!%p353_p7)  ;;  %v1529_v28 = vld [vmem:[%s361_s26 + $0x38] sm:$0xff] (!%p353_p7)  ;;  %v1530_v29 = vld [vmem:[%s361_s26 + $0x40] sm:$0xff] (!%p353_p7) }
  0x22   : > { %1854 = vmatpush3.bf16.msra.mxu1 %v1851_v17  ;;  %v1552_v40 = vld [vmem:[%s2399_s2 + $0x1] ss:$0 sm:$0xff]  ;;  %v1566_v49 = vld [vmem:[%s2400_s3 + $0x78] sm:$0xff]  ;;  %v1554_v51 = vld [vmem:[%s2399_s2 + $0x3] ss:$0 sm:$0xff]  ;;  %s2411_s12 = smov (!%p393_p8, %s1516_s12), 1 }
  0x23   : > { %1862 = vmatpush3.bf16.msra.mxu0 %v1859_v20  ;;  %1864 = vmatprep.subr.bf16.mxu1 %v1863_v33  ;;  %v1875_v53 = vpack.c.bf16 %v1566_v49, %v1565_v48  ;;  %v1553_v57 = vld [vmem:[%s2399_s2 + $0x2] ss:$0 sm:$0xff]  ;;  %v790_v62 = vld [vmem:[%s2400_s3 + $0x8] sm:$0xff]  ;;  %v1556_v0 = vld [vmem:[%s2399_s2 + $0x5] ss:$0 sm:$0xff]  ;;  %s1522_s23 = sshll.u32 %s2411_s12, 3 }
  0x24   : > { %v789_v61 = vld [vmem:[%s2400_s3] sm:$0xff]  ;;  %v1580_v31 = vld [vmem:[%s2402_s5 + $0x28] sm:$0xff]  ;;  %v1581_v32 = vld [vmem:[%s2402_s5 + $0x30] sm:$0xff] }
  0x25   : > { %1693 = vmatmul.mubr.msk.f32.vlgmr.msra.gmra.mrb[0].mxu1 %vm423_vm0, %v1524_v23  ;;  %v2183_v3 = vpack.c.bf16 %v790_v62, %v789_v61  ;;  %v1555_v7 = vld [vmem:[%s2399_s2 + $0x4] ss:$0 sm:$0xff]  ;;  %v1558_v14 = vld [vmem:[%s2399_s2 + $0x7] ss:$0 sm:$0xff]  ;;  %v1557_v19 = vld [vmem:[%s2399_s2 + $0x6] ss:$0 sm:$0xff] }
  0x26   : > { %1713 = vmatmul.mubr.msk.f32.vlgmr.msra.gmra.mrb[0].mxu0 %vm423_vm0, %v1523_v21  ;;  %1695 = vmatprep.mubr.msk.f32.mxu1 %vm423_vm0, %v1525_v24  ;;  %v1551_v22 = vld [vmem:[%s2399_s2] ss:$0 sm:$0xff]  ;;  %v795_v49 = vld [vmem:[%s2400_s3 + $0x30] sm:$0xff]  ;;  %v1576_v61 = vld [vmem:[%s2401_s4 + $0x1] ss:$0 sm:$0xff] }
  0x27   : > { %1715 = vmatprep.mubr.msk.f32.mxu0 %vm423_vm0, %v1524_v23  ;;  %1866 = vmatpush3.bf16.msra.mxu1 %v1863_v33  ;;  %v1579_v30 = vld [vmem:[%s2402_s5 + $0x20] sm:$0xff]  ;;  %v2011_v33 = vmov 0.0|0.0  }
  0x28   : > { %1868 = vmatprep.subr.bf16.mxu1 %v1867_v35  ;;  %1895 = vmatprep.subr.bf16.mxu0 %v2011_v33  ;;  %v1896_v34 = vpack.c.bf16 %v1580_v31, %v1579_v30  ;;  %v1575_v62 = vld [vmem:[%s2401_s4] ss:$0 sm:$0xff] }
  0x29   : > { %1696 = vmatmul.mubr.msk.f32.gmra.mrb[2].mxu1 %vm423_vm0, %v1526_v25 }
  0x2a   : > { %1716 = vmatmul.mubr.msk.f32.gmra.mrb[2].mxu0 %vm423_vm0, %v1525_v24  ;;  %1698 = vmatprep.mubr.msk.f32.mxu1 %vm423_vm0, %v1527_v26 }
  0x2b   : > { %1718 = vmatprep.mubr.msk.f32.mxu0 %vm423_vm0, %v1526_v25  ;;  %1870 = vmatpush3.bf16.msra.mxu1 %v1867_v35  ;;  %v1582_v35 = vld [vmem:[%s2402_s5 + $0x38] sm:$0xff] }
  0x2c   : > { %1872 = vmatprep.subr.bf16.mxu1 %v1871_v42  ;;  %1897 = vmatpush3.bf16.msra.mxu0 %v1896_v34  ;;  %v1368_v34 = vld [vmem:[%s2404_s7 + $0x28] sm:$0xff] }
  0x2d   : > { %1699 = vmatmul.mubr.msk.f32.gmra.mrb[4].mxu1 %vm423_vm0, %v1528_v27  ;;  %1898 = vmatprep.subr.bf16.mxu0 %v2011_v33 }
  0x2e   : > { %1719 = vmatmul.mubr.msk.f32.gmra.mrb[4].mxu0 %vm423_vm0, %v1527_v26  ;;  %1701 = vmatprep.mubr.msk.f32.mxu1 %vm423_vm0, %v1529_v28 }
  0x2f   : > { %1721 = vmatprep.mubr.msk.f32.mxu0 %vm423_vm0, %v1528_v27  ;;  %1874 = vmatpush3.bf16.msra.mxu1 %v1871_v42  ;;  %v792_v42 = vld [vmem:[%s2400_s3 + $0x18] sm:$0xff] }
  0x30   : > { %1876 = vmatprep.subr.bf16.mxu1 %v1875_v53 }
  0x31   : > { %1702 = vmatmul.mubr.msk.f32.gmra.mrb[6].mxu1 %vm423_vm0, %v1530_v29 }
  0x32   : > { %1722 = vmatmul.mubr.msk.f32.gmra.mrb[6].mxu0 %vm423_vm0, %v1529_v28  ;;  %v2010_v28 = vmov 0.0  }
  0x33   : > { %1878 = vmatpush3.bf16.msra.mxu1 %v1875_v53  ;;  %1776 = vmatprep.mubr.msk.f32.mxu0 %vm2012_vm3, %v2010_v28 }
  0x34   : > { %1880 = vmatprep.subr.bf16.mxu1 %v2183_v3 }
  0xf8   : > { %v1694_v36 = vpop.f32.mrb[0].mxu1 }
  0xf9   : > { %v1714_v39 = vpop.f32.mrb[0].mxu0  ;;  %v514_v41 = vpop.f32.mrb[1].mxu1 }
  0xfa   : > { %v649_v43 = vadd.f32 %v1714_v39, %v1694_v36  ;;  %v643_v44 = vpop.f32.mrb[1].mxu0  ;;  %v1899_v36 = vpack.c.bf16 %v1582_v35, %v1581_v32  ;;  %v1367_v32 = vld [vmem:[%s2404_s7 + $0x20] sm:$0xff] }
  0xfb   : > { %v644_v45 = vadd.f32 %v643_v44, %v514_v41  ;;  %v791_v41 = vld [vmem:[%s2400_s3 + $0x10] sm:$0xff]  ;;  %v1926_v35 = vpack.c.bf16 %v1368_v34, %v1367_v32 }
  0xfc   : > { %v739_v46 = vadd.f32 %v1552_v40, %v649_v43  ;;  %v1697_v47 = vpop.f32.mrb[2].mxu1  ;;  %1900 = vmatpush3.bf16.msra.mxu0 %v1899_v36  ;;  %v1883_v43 = vpack.c.bf16 %v792_v42, %v791_v41  ;;  %v1369_v36 = vld [vmem:[%s2404_s7 + $0x30] sm:$0xff]  ;;  %v1374_v42 = vld [vmem:[%s2404_s7 + $0x58] sm:$0xff] }
  0xfd   : > { %v1717_v50 = vpop.f32.mrb[2].mxu0  ;;  %v524_v52 = vpop.f32.mrb[3].mxu1  ;;  %v738_v26 = vadd.f32 %v1551_v22, %v644_v45  ;;  %1907 = vmatprep.subr.bf16.mxu0 %v2011_v33  ;;  %v1363_v22 = vld [vmem:[%s2404_s7] sm:$0xff]  ;;  %v1373_v41 = vld [vmem:[%s2404_s7 + $0x50] sm:$0xff] }
  0xfe   : > { %v747_v54 = vmax.f32 %v739_v46, 0.0  ;;  %v659_v55 = vadd.f32 %v1717_v50, %v1697_v47  ;;  %v653_v56 = vpop.f32.mrb[3].mxu0  ;;  %v793_v46 = vld [vmem:[%s2400_s3 + $0x20] sm:$0xff]  ;;  %v794_v47 = vld [vmem:[%s2400_s3 + $0x28] sm:$0xff] }
  0xff   : > { %v654_v58 = vadd.f32 %v653_v56, %v524_v52  ;;  %v746_v29 = vmax.f32 %v738_v26, 0.0  ;;  %v1887_v48 = vpack.c.bf16 %v794_v47, %v793_v46  ;;  %v796_v52 = vld [vmem:[%s2400_s3 + $0x38] sm:$0xff]  ;;  %v1042_v56 = vld [vmem:[%s2402_s5 + $0x8] sm:$0xff]  ;;  %v1377_v47 = vld [vmem:[%s2404_s7 + $0x70] sm:$0xff] }
 0x100   : > { %761 = vst.msk [vmem:[#allocation2 + $0x8] sm:$0xff] %vm423_vm0, %v747_v54  ;;  %v741_v59 = vadd.f32 %v1554_v51, %v659_v55  ;;  %v1700_v60 = vpop.f32.mrb[4].mxu1  ;;  %v1891_v53 = vpack.c.bf16 %v796_v52, %v795_v49  ;;  %v1041_v55 = vld [vmem:[%s2402_s5] sm:$0xff] }
 0x101   : > { %v1720_v63 = vpop.f32.mrb[4].mxu0  ;;  %v534_v1 = vpop.f32.mrb[5].mxu1  ;;  %v740_v2 = vadd.f32 %v1553_v57, %v654_v58  ;;  %v1902_v57 = vpack.c.bf16 %v1042_v56, %v1041_v55  ;;  %v1043_v58 = vld [vmem:[%s2402_s5 + $0x10] sm:$0xff] }
 0x102   : > { %v749_v4 = vmax.f32 %v741_v59, 0.0  ;;  %v669_v5 = vadd.f32 %v1720_v63, %v1700_v60  ;;  %v663_v6 = vpop.f32.mrb[5].mxu0  ;;  %v1044_v59 = vld [vmem:[%s2402_s5 + $0x18] sm:$0xff]  ;;  %v1585_v63 = vld [vmem:[%s2402_s5 + $0x40] sm:$0xff] }
 0x103   : > { %v664_v8 = vadd.f32 %v663_v6, %v534_v1  ;;  %v748_v9 = vmax.f32 %v740_v2, 0.0  ;;  %v1905_v60 = vpack.c.bf16 %v1044_v59, %v1043_v58  ;;  %v1590_v2 = vld [vmem:[%s2402_s5 + $0x60] sm:$0xff] }
 0x104   : > { %768 = vst.msk [vmem:[#allocation2 + $0x10] sm:$0xff] %vm423_vm0, %v749_v4  ;;  %v743_v10 = vadd.f32 %v1556_v0, %v669_v5  ;;  %v1703_v11 = vpop.f32.mrb[6].mxu1  ;;  %v1586_v0 = vld [vmem:[%s2402_s5 + $0x48] sm:$0xff]  ;;  %v1595_v58 = vld [vmem:[%s2403_s6] ss:$0 sm:$0xff] }
 0x105   : > { %v742_v12 = vadd.f32 %v1555_v7, %v664_v8  ;;  %v1723_v13 = vpop.f32.mrb[6].mxu0  ;;  %763 = vrot.lane.b32.xlu0 %v748_v9, %s2009_s27  ;;  %v544_v15 = vpop.f32.mrb[7].mxu1  ;;  %v1908_v7 = vpack.c.bf16 %v1586_v0, %v1585_v63  ;;  %v1596_v63 = vld [vmem:[%s2405_s8] ss:$0 sm:$0xff] }
 0x106   : > { %v751_v16 = vmax.f32 %v743_v10, 0.0  ;;  %v679_v17 = vadd.f32 %v1723_v13, %v1703_v11  ;;  %v673_v18 = vpop.f32.mrb[7].mxu0  ;;  %v1587_v10 = vld [vmem:[%s2402_s5 + $0x50] sm:$0xff]  ;;  %v1588_v11 = vld [vmem:[%s2402_s5 + $0x58] sm:$0xff] }
 0x107   : > { %v750_v20 = vmax.f32 %v742_v12, 0.0  ;;  %v674_v21 = vadd.f32 %v673_v18, %v544_v15  ;;  %v1592_v15 = vld [vmem:[%s2402_s5 + $0x70] sm:$0xff] }
 0x108   : > { %775 = vst.msk [vmem:[#allocation2 + $0x18] sm:$0xff] %vm423_vm0, %v751_v16  ;;  %v745_v23 = vadd.f32 %v1558_v14, %v679_v17  ;;  %v1577_v14 = vld [vmem:[%s2401_s4 + $0x2] ss:$0 sm:$0xff]  ;;  %v1593_v16 = vld [vmem:[%s2402_s5 + $0x78] sm:$0xff]  ;;  %v1578_v17 = vld [vmem:[%s2401_s4 + $0x3] ss:$0 sm:$0xff] }
 0x109   : > { %770 = vrot.lane.b32.xlu0 %v750_v20, %s2009_s27  ;;  %v744_v24 = vadd.f32 %v1557_v19, %v674_v21  ;;  %v1911_v19 = vpack.c.bf16 %v1588_v11, %v1587_v10  ;;  %v1917_v21 = vpack.c.bf16 %v1593_v16, %v1592_v15 }
 0x10a   : > { %v753_v25 = vmax.f32 %v745_v23, 0.0  ;;  %v1364_v23 = vld [vmem:[%s2404_s7 + $0x8] sm:$0xff] }
 0x10b   : > { %v752_v27 = vmax.f32 %v744_v24, 0.0 }
 0x10c   : > { %782 = vst.msk [vmem:[#allocation2 + $0x20] sm:$0xff] %vm423_vm0, %v753_v25  ;;  %v1920_v25 = vpack.c.bf16 %v1364_v23, %v1363_v22 }
 0x10d   : > { %784 = vst.msk [vmem:[#allocation2 + $0x20] sm:$0xff] %vm758_vm1, %v2010_v28  ;;  %777 = vrot.lane.b32.xlu1 %v752_v27, %s2009_s27  ;;  %v1365_v27 = vld [vmem:[%s2404_s7 + $0x10] sm:$0xff] }
 0x111   : > { %755 = vrot.lane.b32.xlu1 %v746_v29, %s2009_s27  ;;  %v1366_v29 = vld [vmem:[%s2404_s7 + $0x18] sm:$0xff]  ;;  %s396_s27 = scalar_lea.vmem %s2406_s9, %s1522_s23 }
 0x112   : > { %v1923_v31 = vpack.c.bf16 %v1366_v29, %v1365_v27 }
 0x114   : > { %v800_v51 = vld [vmem:[#allocation2 + $0x20] sm:$0xff] }
 0x177   : > { %v764_v37 = vpop.permute.xlu0 %763 }
 0x178   : > { %766 = vst.msk [vmem:[#allocation2 + $0x8] sm:$0xff] %vm758_vm1, %v764_v37  ;;  %v1370_v37 = vld [vmem:[%s2404_s7 + $0x38] sm:$0xff] }
 0x17b   : > { %v771_v38 = vpop.permute.xlu0 %770 }
 0x17c   : > { %773 = vst.msk [vmem:[#allocation2 + $0x10] sm:$0xff] %vm758_vm1, %v771_v38  ;;  %v1929_v38 = vpack.c.bf16 %v1370_v37, %v1369_v36 }
 0x17f   : > { %v778_v39 = vpop.permute.xlu1 %777  ;;  %v797_v40 = vld [vmem:[#allocation2 + $0x8] sm:$0xff] }
 0x180   : > { %780 = vst.msk [vmem:[#allocation2 + $0x18] sm:$0xff] %vm758_vm1, %v778_v39  ;;  %1740 = vmatprep.mubr.msk.f32.mxu1 %vm810_vm2, %v797_v40  ;;  %v1372_v39 = vld [vmem:[%s2404_s7 + $0x48] sm:$0xff] }
 0x183   : > { %v756_v44 = vpop.permute.xlu1 %755  ;;  %v798_v45 = vld [vmem:[#allocation2 + $0x10] sm:$0xff] }
 0x184   : > { %759 = vst.msk [vmem:[#allocation2] sm:$0xff] %vm758_vm1, %v756_v44  ;;  %1741 = vmatmul.mubr.msk.f32.vlgmr.msra.gmra.mrb[8].mxu1 %vm810_vm2, %v798_v45  ;;  %v1375_v44 = vld [vmem:[%s2404_s7 + $0x60] sm:$0xff] }
 0x185   : > { %783 = vst.msk [vmem:[#allocation2] sm:$0xff] %vm423_vm0, %v2010_v28  ;;  %1882 = vmatpush3.bf16.msra.mxu1 %v2183_v3  ;;  %v1591_v3 = vld [vmem:[%s2402_s5 + $0x68] sm:$0xff] }
 0x186   : > { %1884 = vmatprep.subr.bf16.mxu1 %v1883_v43  ;;  %v1914_v9 = vpack.c.bf16 %v1591_v3, %v1590_v2 }
 0x187   : > { %v799_v50 = vld [vmem:[#allocation2 + $0x18] sm:$0xff] }
 0x188   : > { %1743 = vmatprep.mubr.msk.f32.mxu1 %vm810_vm2, %v799_v50 }
 0x189   : > { %1886 = vmatpush3.bf16.msra.mxu1 %v1883_v43  ;;  %v1935_v43 = vpack.c.bf16 %v1374_v42, %v1373_v41 }
 0x18a   : > { %1888 = vmatprep.subr.bf16.mxu1 %v1887_v48  ;;  %1744 = vmatmul.mubr.msk.f32.gmra.mrb[10].mxu1 %vm810_vm2, %v800_v51 }
 0x18c   : > { %v785_v54 = vld [vmem:[#allocation2] sm:$0xff] }
 0x18d   : > { %1890 = vmatpush3.bf16.msra.mxu1 %v1887_v48  ;;  %1762 = vmatprep.mubr.msk.f32.mxu1 %vm810_vm2, %v785_v54  ;;  %v1378_v48 = vld [vmem:[%s2404_s7 + $0x78] sm:$0xff] }
 0x18e   : > { %1892 = vmatprep.subr.bf16.mxu1 %v1891_v53  ;;  %v1941_v49 = vpack.c.bf16 %v1378_v48, %v1377_v47 }
 0x191   : > { %1894 = vmatpush3.bf16.msra.mxu1 %v1891_v53 }
 0x192   : > { %1901 = vmatprep.subr.bf16.mxu1 %v2011_v33 }
 0x194   : > { %1763 = vmatmul.mubr.msk.f32.vlgmr.msra.gmra.mrb[8].mxu1 %vm810_vm2, %v797_v40 }
 0x195   : > { %1765 = vmatprep.mubr.msk.f32.mxu1 %vm810_vm2, %v798_v45  ;;  %1903 = vmatpush3.bf16.msra.mxu1 %v1902_v57  ;;  %v1376_v45 = vld [vmem:[%s2404_s7 + $0x68] sm:$0xff] }
 0x196   : > { %1904 = vmatprep.subr.bf16.mxu1 %v2011_v33  ;;  %v1938_v46 = vpack.c.bf16 %v1376_v45, %v1375_v44 }
 0x198   : > { %1766 = vmatmul.mubr.msk.f32.gmra.mrb[10].mxu1 %vm810_vm2, %v799_v50 }
 0x199   : > { %1906 = vmatpush3.bf16.msra.mxu1 %v1905_v60  ;;  %1787 = vmatprep.mubr.msk.f32.mxu1 %vm2012_vm3, %v2010_v28 }
 0x19a   : > { %1913 = vmatprep.subr.bf16.mxu1 %v2011_v33 }
 0x267   : > { %v1764_v1 = vpop.f32.mrb[8].mxu1 }
 0x268   : > { %v1034_v4 = vadd.f32 %v1764_v1, %v1576_v61  ;;  %v986_v5 = vpop.f32.mrb[9].mxu1 }
 0x269   : > { %v1033_v6 = vadd.f32 %v1575_v62, %v986_v5 }
 0x26a   : > { %v1038_v8 = vmax.f32 %v1034_v4, 0.0 }
 0x26b   : > { %v1037_v12 = vmax.f32 %v1033_v6, 0.0  ;;  %v1767_v13 = vpop.f32.mrb[10].mxu1 }
 0x26c   : > { %v996_v18 = vpop.f32.mrb[11].mxu1  ;;  %1777 = vmatmul.mubr.msk.f32.vlgmr.msra.gmra.mrb[8].mxu0 %vm423_vm0, %v1038_v8  ;;  %v1036_v24 = vadd.f32 %v1767_v13, %v1578_v17 }
 0x26d   : > { %1909 = vmatpush3.bf16.msra.mxu0 %v1908_v7  ;;  %1788 = vmatmul.mubr.msk.f32.vlgmr.msra.gmra.mrb[12].mxu1 %vm423_vm0, %v1037_v12  ;;  %v1035_v20 = vadd.f32 %v1577_v14, %v996_v18 }
 0x26e   : > { %1915 = vmatpush3.bf16.msra.mxu1 %v1914_v9  ;;  %1910 = vmatprep.subr.bf16.mxu0 %v2011_v33  ;;  %v1040_v30 = vmax.f32 %v1036_v24, 0.0 }
 0x26f   : > { %1916 = vmatprep.subr.bf16.mxu1 %v2011_v33  ;;  %1798 = vmatprep.mubr.msk.f32.mxu0 %vm2012_vm3, %v2010_v28  ;;  %v1039_v26 = vmax.f32 %v1035_v20, 0.0 }
 0x270   : > { %1809 = vmatprep.mubr.msk.f32.mxu1 %vm2012_vm3, %v2010_v28 }
 0x271   : > { %1912 = vmatpush3.bf16.msra.mxu0 %v1911_v19 }
 0x272   : > { %1918 = vmatpush3.bf16.msra.mxu1 %v1917_v21  ;;  %1919 = vmatprep.subr.bf16.mxu0 %v2011_v33 }
 0x274   : > { %1799 = vmatmul.mubr.msk.f32.vlgmr.msra.gmra.mrb[10].mxu0 %vm423_vm0, %v1039_v26 }
 0x275   : > { %1810 = vmatmul.mubr.msk.f32.vlgmr.msra.gmra.mrb[14].mxu1 %vm423_vm0, %v1040_v30  ;;  %1921 = vmatpush3.bf16.msra.mxu0 %v1920_v25 }
 0x276   : > { %1922 = vmatprep.subr.bf16.mxu0 %v2011_v33  ;;  %1844 = vmatprep.mubr.msk.f32.mxu0 %vm2012_vm3, %v2010_v28  ;;  %v1371_v28 = vld [vmem:[%s2404_s7 + $0x40] sm:$0xff] }
 0x277   : > { %v1932_v40 = vpack.c.bf16 %v1372_v39, %v1371_v28 }
 0x279   : > { %1924 = vmatpush3.bf16.msra.mxu0 %v1923_v31 }
 0x27a   : > { %1925 = vmatprep.subr.bf16.mxu0 %v2011_v33 }
 0x27d   : > { %1927 = vmatpush3.bf16.msra.mxu0 %v1926_v35 }
 0x27e   : > { %1928 = vmatprep.subr.bf16.mxu0 %v2011_v33 }
 0x281   : > { %1930 = vmatpush3.bf16.msra.mxu0 %v1929_v38 }
 0x282   : > { %1931 = vmatprep.subr.bf16.mxu0 %v2011_v33 }
 0x285   : > { %1933 = vmatpush3.bf16.msra.mxu0 %v1932_v40 }
 0x286   : > { %1934 = vmatprep.subr.bf16.mxu0 %v2011_v33 }
 0x289   : > { %1936 = vmatpush3.bf16.msra.mxu0 %v1935_v43 }
 0x28a   : > { %1937 = vmatprep.subr.bf16.mxu0 %v2011_v33 }
 0x28d   : > { %1939 = vmatpush3.bf16.msra.mxu0 %v1938_v46 }
 0x28e   : > { %1940 = vmatprep.subr.bf16.mxu0 %v2011_v33 }
 0x291   : > { %1942 = vmatpush3.bf16.msra.mxu0 %v1941_v49 }
 0x33f   : > { %v1119_v50 = vpop.f32.mrb[8].mxu0 }
 0x340   : > { %v1778_v51 = vpop.f32.mrb[9].mxu0  ;;  %v1192_v52 = vpop.f32.mrb[12].mxu1 }
 0x341   : > { %v1193_v53 = vadd.f32 %v1192_v52, %v1119_v50  ;;  %v1789_v54 = vpop.f32.mrb[13].mxu1 }
 0x347   : > { %v1270_v55 = vpop.f32.mrb[10].mxu0 }
 0x348   : > { %v1274_v56 = vadd.f32 %v1270_v55, %v1193_v53  ;;  %v1800_v33 = vpop.f32.mrb[11].mxu0  ;;  %v1349_v57 = vpop.f32.mrb[14].mxu1 }
 0x349   : > { %v1811_v59 = vpop.f32.mrb[15].mxu1 }
 0x34a   : > { %v1353_v60 = vadd.f32 %v1349_v57, %v1274_v56 }
 0x34c   : > { %v1361_v61 = vadd.f32 %v1595_v58, %v1353_v60 }
 0x34e   : > { %v1362_v62 = vmax.f32 %v1361_v61, 0.0 }
 0x350   : > { %1845 = vmatmul.mubr.f32.vlgmr.msra.gmra.mrb[12].mxu0 %v1362_v62 }
 0x423   : > { %v1452_v0 = vpop.f32.mrb[12].mxu0 }
 0x424   : > { %v1453_v1 = vadd.f32 %v1596_v63, %v1452_v0  ;;  %v1846_v2 = vpop.f32.mrb[13].mxu0 }
 0x426   : > { %1456 = vst [vmem:[%s396_s27] sm:$0xff] %v1453_v1 }
 0x427 PF: > { %p16_p9 = scmp.ge.s32.totalorder %s2080_s13, 4   ;;  %s2407_s30 = smov %s2003_s10 }
 0x428   : > { %s2408_s10 = smov %s2089_s16  ;;  %s2409_s11 = smov %s2080_s13 }
 0x429   :  { %18 = sbr.rel (!%p16_p9) target bundleno = 2 (0x2), region = 139 }

</bundles_post_ra>
